<compile_context>
chip_gen: v6e
topology: v6e:2x2x1
jax: 0.10.0
libtpu: 0.0.40
codegen_flags: <defaults>
</compile_context>

<pallas_src>
import jax
import jax.numpy as jnp
import numpy as np
from jax.experimental import pallas as pl
from jax.experimental.pallas import tpu as pltpu


class ModelKey:
    """Placeholder mirroring the (undefined-in-snippet) ModelKey object."""

    def __init__(self):
        self.name = "base_model"


# ---------------------------------------------------------------------------
# Stand-in Pallas kernel: whole-array identity via a single HBM -> HBM DMA.
# No VMEM staging, no grid, no tiling constraints.
# ---------------------------------------------------------------------------
def _hbm_copy_kernel(x_hbm_ref, o_hbm_ref, sem):
    copy = pltpu.make_async_copy(x_hbm_ref, o_hbm_ref, sem)
    copy.start()
    copy.wait()


def pallas_identity(x: jax.Array) -> jax.Array:
    """Identity computed through a Pallas TPU kernel.

    Both operands stay in HBM (memory_space=pl.ANY); the kernel issues one
    direct HBM->HBM DMA for the full array.  Works for any shape/dtype, does
    not donate the input buffer, and uses no VMEM beyond the DMA semaphore.
    """
    return pl.pallas_call(
        _hbm_copy_kernel,
        out_shape=jax.ShapeDtypeStruct(x.shape, x.dtype),
        in_specs=[pl.BlockSpec(memory_space=pl.ANY)],
        out_specs=pl.BlockSpec(memory_space=pl.ANY),
        scratch_shapes=[pltpu.SemaphoreType.DMA],
    )(x)


# ---------------------------------------------------------------------------
# JAX mirror of the abstract PyTorch base `Model`.
# ---------------------------------------------------------------------------
class Model:
    """JAX/Pallas mirror of the abstract PyTorch base `Model`."""

    def __init__(self):
        self.modelkey = ModelKey()

    def forward(self, *args, **kwargs):
        raise NotImplementedError

    def inference(self, *args, **kwargs):
        # @torch.no_grad() has no JAX equivalent needed here (no autograd tape).
        raise NotImplementedError


if __name__ == "__main__":
    # 1) Verify the base-class contract matches the PyTorch module.
    model = Model()
    for method in (model.forward, model.inference):
        try:
            method()
            raise AssertionError("expected NotImplementedError")
        except NotImplementedError:
            pass

    key = jax.random.PRNGKey(0)
    k0, k1, k2 = jax.random.split(key, 3)

    # 2) f32 input, (8, 128): single whole-ref HBM->HBM DMA, no grid.
    x_f32 = jax.random.normal(k0, (8, 128), dtype=jnp.float32)
    y_f32 = jax.block_until_ready(pallas_identity(x_f32))
    assert y_f32.shape == (8, 128) and y_f32.dtype == jnp.float32
    # Input is NOT donated anymore -> x_f32 is still valid to read here.
    assert np.array_equal(np.asarray(jax.device_get(y_f32)),
                          np.asarray(jax.device_get(x_f32)))

    # 3) bf16 input, (16, 256): dtype handled with no packing/tiling concerns.
    x_bf16 = jax.random.normal(k1, (16, 256), dtype=jnp.float32).astype(jnp.bfloat16)
    y_bf16 = jax.block_until_ready(pallas_identity(x_bf16))
    assert y_bf16.shape == (16, 256) and y_bf16.dtype == jnp.bfloat16
    assert np.array_equal(np.asarray(jax.device_get(y_bf16)),
                          np.asarray(jax.device_get(x_bf16)))

    # 4) Ragged shape (10, 96): no sublane/lane divisibility requirement and
    #    no full-array VMEM fallback -- the whole-ref DMA just handles it.
    x_rag = jax.random.normal(k2, (10, 96), dtype=jnp.float32)
    y_rag = jax.block_until_ready(pallas_identity(x_rag))
    assert y_rag.shape == (10, 96) and y_rag.dtype == jnp.float32
    assert np.array_equal(np.asarray(jax.device_get(y_rag)),
                          np.asarray(jax.device_get(x_rag)))

    print("KERNEL_OK")
</pallas_src>

<mosaic_0001>
module attributes {stable_mosaic.version = 11 : i64} {
  func.func @_hbm_copy_kernel(%arg0: memref<8x128xf32, #tpu.memory_space<any>>, %arg1: memref<8x128xf32, #tpu.memory_space<any>>, %arg2: memref<!tpu.dma_semaphore, #tpu.memory_space<semaphore_mem>>) attributes {dimension_semantics = [], scalar_prefetch = 0 : i64, scratch_operands = 1 : i64, tpu.core_type = #tpu.core_type<tc>} {
    tpu.enqueue_dma source(%arg0 : memref<8x128xf32, #tpu.memory_space<any>>) target(%arg1 : memref<8x128xf32, #tpu.memory_space<any>>) target_semaphore(%arg2 : memref<!tpu.dma_semaphore, #tpu.memory_space<semaphore_mem>>)
    tpu.wait_dma2 semaphore(%arg2 : memref<!tpu.dma_semaphore, #tpu.memory_space<semaphore_mem>>) src(%arg0 : memref<8x128xf32, #tpu.memory_space<any>>) dst(%arg1 : memref<8x128xf32, #tpu.memory_space<any>>)
    return
  }
}

</mosaic_0001>

<bundles_post_ra>
// kernel: tpu_custom_call.1
= control target key start
LH: loop header
LB: loop body
LE: loop exit
PB: predicated region body
PF: predicated region fallthrough
CT: control target
= control target key end

     0   :  { %s28_s6 = smov [#allocation2]   ;;  %s29_s7 = smov 131072   ;;  %s47_s0 = inlined_call_operand.hbm [shape: f32[8,128], index: 0, kind: input, shape index: {}]   ;;  %s48_s1 = inlined_call_operand.hbm [shape: f32[8,128], index: 1, kind: output, shape index: {}]  }
   0x1   :  { %s30_s8 = smov 0  }
   0x2   :  { %12 = dma.general %s47_s0, 128, %s48_s1, %s28_s6, %s29_s7, [#allocation4], %s30_s8, 0  }
   0x3   :  { %26 = dma.done.wait [#allocation2], 128 }
   0x4   :  { %27 = vsyncadd [#allocation2], 4294967168 }
   0x5   :  { %16 = vsyncmov [#allocation2] }
   0x8   :  { %s17_s13 = vpop.sfrf %16 }
   0x9   :  { %p22_p0 = scmp.ne.s32.totalorder %s17_s13, 0 }
   0xb   :  { %21 = shalt.err (%p22_p0)  }

</bundles_post_ra>
